<compile_context>
chip_gen: v5e
topology: v5e:2x2
jax: 0.10.0
libtpu: 0.0.40
codegen_flags: <defaults>
</compile_context>

<pallas_src>
import functools

import numpy as np
import jax
import jax.numpy as jnp
from jax.experimental import pallas as pl
from jax.experimental.pallas import tpu as pltpu


# ---------------------------------------------------------------------------
# Deterministic "parameter" setup (the Gaussian window from SSIM.__init__).
# ---------------------------------------------------------------------------
def _fspecial_gauss_1d(size: int, sigma: float) -> np.ndarray:
    coords = np.arange(size, dtype=np.float32) - size // 2
    g = np.exp(-(coords ** 2) / (2.0 * sigma ** 2)).astype(np.float32)
    return g / g.sum()


def _band_matrix(g: np.ndarray, n_in: int) -> np.ndarray:
    """(n_out, n_in) matrix B with B[i, i+k] = g[k]: B @ v == 'valid' 1-D conv."""
    win = g.shape[0]
    n_out = n_in - win + 1
    b = np.zeros((n_out, n_in), np.float32)
    for i in range(n_out):
        b[i, i:i + win] = g
    return b


# ---------------------------------------------------------------------------
# Pallas kernel: one batch image (all channels) per grid step.
#   gv_ref  : (hc, H)      vertical Gaussian band matrix
#   ght_ref : (W, wc)      horizontal Gaussian band matrix (shared by channels)
#   sel_ref : (C*wc, C)    per-channel mean selector (1/(hc*wc) folded in)
#   x_ref, y_ref : (C, H, W)  image planes in their native dtype
#   out_ref : (1, 2*C)     [ssim_per_channel | cs_per_channel] for this image
# ---------------------------------------------------------------------------
def _ssim_kernel(gv_ref, ght_ref, sel_ref, x_ref, y_ref, out_ref, *, c1, c2):
    C, H, W = x_ref.shape
    hc = gv_ref.shape[0]
    wc = ght_ref.shape[1]

    # Upcast inside the kernel: HBM->VMEM DMA stays in the native dtype.
    x = x_ref[...].astype(jnp.float32)   # (C, H, W)
    y = y_ref[...].astype(jnp.float32)
    gv = gv_ref[...]                     # (hc, H)
    ght = ght_ref[...]                   # (W, wc)
    sel = sel_ref[...]                   # (C*wc, C), includes the 1/(hc*wc) factor

    # 5 planes x C channels, plane-major (index i = p*C + c), stacked along
    # sublanes -> one (5*C*H, W) operand for a single horizontal band matmul.
    xs = [x[c] for c in range(C)]
    ys = [y[c] for c in range(C)]
    planes = (xs + ys
              + [a * a for a in xs]
              + [b * b for b in ys]
              + [a * b for a, b in zip(xs, ys)])
    stacked = jnp.concatenate(planes, axis=0)                       # (5*C*H, W)

    # Horizontal 'valid' Gaussian pass for everything: ONE MXU matmul.
    hpass = jnp.dot(stacked, ght, preferred_element_type=jnp.float32)  # (5*C*H, wc)

    # Re-pack the row blocks along lanes so the vertical pass is also a single
    # matmul shared by all planes/channels.
    packed = jnp.concatenate(
        [hpass[i * H:(i + 1) * H, :] for i in range(5 * C)], axis=1)   # (H, 5*C*wc)

    # Vertical 'valid' Gaussian pass: ONE MXU matmul.
    vpass = jnp.dot(gv, packed, preferred_element_type=jnp.float32)    # (hc, 5*C*wc)

    Cw = C * wc
    mu1 = vpass[:, 0 * Cw:1 * Cw]        # (hc, C*wc), channel c in lanes [c*wc,(c+1)*wc)
    mu2 = vpass[:, 1 * Cw:2 * Cw]
    e_xx = vpass[:, 2 * Cw:3 * Cw]
    e_yy = vpass[:, 3 * Cw:4 * Cw]
    e_xy = vpass[:, 4 * Cw:5 * Cw]

    mu1_sq = mu1 * mu1
    mu2_sq = mu2 * mu2
    mu1_mu2 = mu1 * mu2
    sigma1_sq = e_xx - mu1_sq            # compensation == 1.0
    sigma2_sq = e_yy - mu2_sq
    sigma12 = e_xy - mu1_mu2

    cs_map = (2.0 * sigma12 + c2) / (sigma1_sq + sigma2_sq + c2)
    ssim_map = (2.0 * mu1_mu2 + c1) / (mu1_sq + mu2_sq + c1) * cs_map

    # Per-channel spatial mean (== torch.flatten(map, 2).mean(-1)) via a small
    # selector matmul; both results merged into a single (1, 2*C) row write.
    ssim_row = jnp.sum(jnp.dot(ssim_map, sel, preferred_element_type=jnp.float32),
                       axis=0, keepdims=True)                          # (1, C)
    cs_row = jnp.sum(jnp.dot(cs_map, sel, preferred_element_type=jnp.float32),
                     axis=0, keepdims=True)                            # (1, C)
    out_ref[...] = jnp.concatenate([ssim_row, cs_row], axis=1)         # (1, 2*C)


def _ssim_pallas(x, y, *, data_range, win_size, win_sigma, K):
    assert x.shape == y.shape and x.ndim == 4, (x.shape, y.shape)
    N, C, H, W = x.shape
    assert win_size % 2 == 1, "Window size should be odd."
    # TODO(synk): handle the "skip Gaussian smoothing" path (H or W < win_size).
    assert H >= win_size and W >= win_size

    hc, wc = H - win_size + 1, W - win_size + 1
    g = _fspecial_gauss_1d(win_size, win_sigma)

    gv = _band_matrix(g, H)            # (hc, H): vertical pass, applied as gv @ img
    ght = _band_matrix(g, W).T         # (W, wc): horizontal pass, applied as img @ ght
    sel = np.zeros((C * wc, C), np.float32)
    for c in range(C):
        sel[c * wc:(c + 1) * wc, c] = 1.0 / float(hc * wc)

    c1 = float((K[0] * data_range) ** 2)
    c2 = float((K[1] * data_range) ** 2)

    # Size the scoped VMEM limit to the real per-step working set
    # (double-buffered native-dtype inputs + f32 intermediates), clamped to a
    # value that is valid on every TPU generation (<= 64 MiB).
    in_bytes = jnp.dtype(x.dtype).itemsize
    plane = C * H * W
    est = (2 * 2 * plane * in_bytes          # x/y input double buffers
           + 2 * plane * 4                   # f32 copies of x, y
           + 5 * plane * 4                   # stacked planes
           + 2 * 5 * C * H * wc * 4          # hpass + packed
           + 8 * hc * C * wc * 4             # vpass + SSIM maps
           + 4 * (hc * H + W * wc + C * wc * C))
    vmem_limit = int(min(64 * 1024 * 1024, max(32 * 1024 * 1024, 2 * est)))

    kernel = functools.partial(_ssim_kernel, c1=c1, c2=c2)

    # TODO(synk): pad W (or C*wc) to a multiple of 128 for unmasked vld/vst on
    # the elementwise section when planes are large.
    out = pl.pallas_call(
        kernel,
        grid=(N,),
        in_specs=[
            pl.BlockSpec((hc, H), lambda n: (0, 0)),                  # gv
            pl.BlockSpec((W, wc), lambda n: (0, 0)),                  # ght
            pl.BlockSpec((C * wc, C), lambda n: (0, 0)),              # sel
            pl.BlockSpec((None, C, H, W), lambda n: (n, 0, 0, 0)),    # x (native dtype)
            pl.BlockSpec((None, C, H, W), lambda n: (n, 0, 0, 0)),    # y (native dtype)
        ],
        out_specs=pl.BlockSpec((None, 1, 2 * C), lambda n: (n, 0, 0)),
        out_shape=jax.ShapeDtypeStruct((N, 1, 2 * C), jnp.float32),
        compiler_params=pltpu.CompilerParams(
            dimension_semantics=("parallel",),
            vmem_limit_bytes=vmem_limit),
    )(jnp.asarray(gv), jnp.asarray(ght), jnp.asarray(sel), x, y)

    out = out.reshape(N, 2 * C)
    return out[:, :C], out[:, C:]


# ---------------------------------------------------------------------------
# SSIM "module" mirroring the PyTorch class defaults.
# ---------------------------------------------------------------------------
class SSIM:
    def __init__(self, data_range=255.0, size_average=True, win_size=11,
                 win_sigma=1.5, channel=3, spatial_dims=2, K=(0.01, 0.03),
                 nonnegative_ssim=False):
        del channel, spatial_dims  # all channels share the same 1-D window
        self.data_range = float(data_range)
        self.size_average = size_average
        self.win_size = win_size
        self.win_sigma = win_sigma
        self.K = K
        self.nonnegative_ssim = nonnegative_ssim

    def __call__(self, X, Y):
        ssim_per_channel, _cs = _ssim_pallas(
            X, Y, data_range=self.data_range, win_size=self.win_size,
            win_sigma=self.win_sigma, K=self.K)
        if self.nonnegative_ssim:
            ssim_per_channel = jax.nn.relu(ssim_per_channel)
        if self.size_average:
            return jnp.mean(ssim_per_channel)
        return jnp.mean(ssim_per_channel, axis=1)


# ---------------------------------------------------------------------------
# Pure-JAX reference (same math, batched) used only for a sanity check.
# ---------------------------------------------------------------------------
def _ssim_reference(x, y, *, data_range, win_size, win_sigma, K):
    g = jnp.asarray(_fspecial_gauss_1d(win_size, win_sigma))
    N, C, H, W = x.shape
    hc, wc = H - win_size + 1, W - win_size + 1

    def blur(img):
        v = sum(g[k] * img[:, :, k:k + hc, :] for k in range(win_size))
        h = sum(g[k] * v[:, :, :, k:k + wc] for k in range(win_size))
        return h

    c1 = (K[0] * data_range) ** 2
    c2 = (K[1] * data_range) ** 2
    mu1, mu2 = blur(x), blur(y)
    s1 = blur(x * x) - mu1 ** 2
    s2 = blur(y * y) - mu2 ** 2
    s12 = blur(x * y) - mu1 * mu2
    cs_map = (2 * s12 + c2) / (s1 + s2 + c2)
    ssim_map = (2 * mu1 * mu2 + c1) / (mu1 ** 2 + mu2 ** 2 + c1) * cs_map
    return jnp.mean(ssim_map.reshape(N, C, -1).mean(-1))


if __name__ == "__main__":
    key = jax.random.PRNGKey(0)
    k1, k2 = jax.random.split(key)
    N, C, H, W = 2, 4, 16, 16
    X = jax.random.uniform(k1, (N, C, H, W), jnp.float32, 0.0, 255.0)
    Y = jax.random.uniform(k2, (N, C, H, W), jnp.float32, 0.0, 255.0)

    module = SSIM(data_range=255.0, size_average=True, win_size=11,
                  win_sigma=1.5, channel=C, spatial_dims=2)
    out = module(X, Y)
    out = jax.block_until_ready(out)

    ref = _ssim_reference(X, Y, data_range=255.0, win_size=11,
                          win_sigma=1.5, K=(0.01, 0.03))
    assert out.shape == ()  # size_average=True -> scalar
    assert jnp.allclose(out, ref, atol=2e-4, rtol=2e-4), (out, ref)
    print("KERNEL_OK")
</pallas_src>

<mosaic_0001>
module attributes {stable_mosaic.version = 11 : i64} {
  func.func @_ssim_kernel(%arg0: i32, %arg1: memref<6x16xf32, #tpu.memory_space<vmem>>, %arg2: memref<16x6xf32, #tpu.memory_space<vmem>>, %arg3: memref<24x4xf32, #tpu.memory_space<vmem>>, %arg4: memref<1x4x16x16xf32, #tpu.memory_space<vmem>>, %arg5: memref<1x4x16x16xf32, #tpu.memory_space<vmem>>, %arg6: memref<1x1x8xf32, #tpu.memory_space<vmem>>) attributes {dimension_semantics = [#tpu.dimension_semantics<parallel>], iteration_bounds = array<i64: 2>, scalar_prefetch = 0 : i64, scratch_operands = 0 : i64, tpu.core_type = #tpu.core_type<tc>, window_params = [{pipeline_mode = #tpu.pipeline_mode<synchronous>, transform_indices = @transform_0, window_bounds = array<i64: 6, 16>}, {pipeline_mode = #tpu.pipeline_mode<synchronous>, transform_indices = @transform_1, window_bounds = array<i64: 16, 6>}, {pipeline_mode = #tpu.pipeline_mode<synchronous>, transform_indices = @transform_2, window_bounds = array<i64: 24, 4>}, {transform_indices = @transform_3, window_bounds = array<i64: 1, 4, 16, 16>}, {transform_indices = @transform_4, window_bounds = array<i64: 1, 4, 16, 16>}, {transform_indices = @transform_5, window_bounds = array<i64: 1, 1, 8>}]} {
    %c0 = arith.constant 0 : index
    %c0_0 = arith.constant 0 : index
    %c0_1 = arith.constant 0 : index
    %c0_2 = arith.constant 0 : index
    %0 = vector.load %arg4[%c0, %c0_0, %c0_1, %c0_2] : memref<1x4x16x16xf32, #tpu.memory_space<vmem>>, vector<1x4x16x16xf32>
    %1 = vector.shape_cast %0 : vector<1x4x16x16xf32> to vector<4x16x16xf32>
    %c0_3 = arith.constant 0 : index
    %c0_4 = arith.constant 0 : index
    %c0_5 = arith.constant 0 : index
    %c0_6 = arith.constant 0 : index
    %2 = vector.load %arg5[%c0_3, %c0_4, %c0_5, %c0_6] : memref<1x4x16x16xf32, #tpu.memory_space<vmem>>, vector<1x4x16x16xf32>
    %3 = vector.shape_cast %2 : vector<1x4x16x16xf32> to vector<4x16x16xf32>
    %c0_7 = arith.constant 0 : index
    %c0_8 = arith.constant 0 : index
    %4 = vector.load %arg1[%c0_7, %c0_8] : memref<6x16xf32, #tpu.memory_space<vmem>>, vector<6x16xf32>
    %c0_9 = arith.constant 0 : index
    %c0_10 = arith.constant 0 : index
    %5 = vector.load %arg2[%c0_9, %c0_10] : memref<16x6xf32, #tpu.memory_space<vmem>>, vector<16x6xf32>
    %c0_11 = arith.constant 0 : index
    %c0_12 = arith.constant 0 : index
    %6 = vector.load %arg3[%c0_11, %c0_12] : memref<24x4xf32, #tpu.memory_space<vmem>>, vector<24x4xf32>
    %7 = vector.extract_strided_slice %1 {offsets = [0, 0, 0], sizes = [1, 16, 16], strides = [1, 1, 1]} : vector<4x16x16xf32> to vector<1x16x16xf32>
    %8 = vector.shape_cast %7 : vector<1x16x16xf32> to vector<16x16xf32>
    %9 = vector.extract_strided_slice %1 {offsets = [1, 0, 0], sizes = [1, 16, 16], strides = [1, 1, 1]} : vector<4x16x16xf32> to vector<1x16x16xf32>
    %10 = vector.shape_cast %9 : vector<1x16x16xf32> to vector<16x16xf32>
    %11 = vector.extract_strided_slice %1 {offsets = [2, 0, 0], sizes = [1, 16, 16], strides = [1, 1, 1]} : vector<4x16x16xf32> to vector<1x16x16xf32>
    %12 = vector.shape_cast %11 : vector<1x16x16xf32> to vector<16x16xf32>
    %13 = vector.extract_strided_slice %1 {offsets = [3, 0, 0], sizes = [1, 16, 16], strides = [1, 1, 1]} : vector<4x16x16xf32> to vector<1x16x16xf32>
    %14 = vector.shape_cast %13 : vector<1x16x16xf32> to vector<16x16xf32>
    %15 = vector.extract_strided_slice %3 {offsets = [0, 0, 0], sizes = [1, 16, 16], strides = [1, 1, 1]} : vector<4x16x16xf32> to vector<1x16x16xf32>
    %16 = vector.shape_cast %15 : vector<1x16x16xf32> to vector<16x16xf32>
    %17 = vector.extract_strided_slice %3 {offsets = [1, 0, 0], sizes = [1, 16, 16], strides = [1, 1, 1]} : vector<4x16x16xf32> to vector<1x16x16xf32>
    %18 = vector.shape_cast %17 : vector<1x16x16xf32> to vector<16x16xf32>
    %19 = vector.extract_strided_slice %3 {offsets = [2, 0, 0], sizes = [1, 16, 16], strides = [1, 1, 1]} : vector<4x16x16xf32> to vector<1x16x16xf32>
    %20 = vector.shape_cast %19 : vector<1x16x16xf32> to vector<16x16xf32>
    %21 = vector.extract_strided_slice %3 {offsets = [3, 0, 0], sizes = [1, 16, 16], strides = [1, 1, 1]} : vector<4x16x16xf32> to vector<1x16x16xf32>
    %22 = vector.shape_cast %21 : vector<1x16x16xf32> to vector<16x16xf32>
    %23 = arith.mulf %8, %8 : vector<16x16xf32>
    %24 = arith.mulf %10, %10 : vector<16x16xf32>
    %25 = arith.mulf %12, %12 : vector<16x16xf32>
    %26 = arith.mulf %14, %14 : vector<16x16xf32>
    %27 = arith.mulf %16, %16 : vector<16x16xf32>
    %28 = arith.mulf %18, %18 : vector<16x16xf32>
    %29 = arith.mulf %20, %20 : vector<16x16xf32>
    %30 = arith.mulf %22, %22 : vector<16x16xf32>
    %31 = arith.mulf %8, %16 : vector<16x16xf32>
    %32 = arith.mulf %10, %18 : vector<16x16xf32>
    %33 = arith.mulf %12, %20 : vector<16x16xf32>
    %34 = arith.mulf %14, %22 : vector<16x16xf32>
    %35 = tpu.concatenate %8, %10, %12, %14, %16, %18, %20, %22, %23, %24, %25, %26, %27, %28, %29, %30 in 0 : vector<16x16xf32>, vector<16x16xf32>, vector<16x16xf32>, vector<16x16xf32>, vector<16x16xf32>, vector<16x16xf32>, vector<16x16xf32>, vector<16x16xf32>, vector<16x16xf32>, vector<16x16xf32>, vector<16x16xf32>, vector<16x16xf32>, vector<16x16xf32>, vector<16x16xf32>, vector<16x16xf32>, vector<16x16xf32> -> vector<256x16xf32>
    %36 = tpu.concatenate %31, %32, %33, %34 in 0 : vector<16x16xf32>, vector<16x16xf32>, vector<16x16xf32>, vector<16x16xf32> -> vector<64x16xf32>
    %37 = tpu.concatenate %35, %36 in 0 : vector<256x16xf32>, vector<64x16xf32> -> vector<320x16xf32>
    %cst = arith.constant dense<0.000000e+00> : vector<320x6xf32>
    %38 = tpu.matmul %37, %5, %cst {dimension_numbers = #tpu.dot_dimension_numbers<[1], [0], [0], [1], [0, 0, 1, 1], [], []>} : vector<320x16xf32>, vector<16x6xf32>, vector<320x6xf32> -> vector<320x6xf32>
    %39 = vector.extract_strided_slice %38 {offsets = [0, 0], sizes = [16, 6], strides = [1, 1]} : vector<320x6xf32> to vector<16x6xf32>
    %40 = vector.extract_strided_slice %38 {offsets = [16, 0], sizes = [16, 6], strides = [1, 1]} : vector<320x6xf32> to vector<16x6xf32>
    %41 = vector.extract_strided_slice %38 {offsets = [32, 0], sizes = [16, 6], strides = [1, 1]} : vector<320x6xf32> to vector<16x6xf32>
    %42 = vector.extract_strided_slice %38 {offsets = [48, 0], sizes = [16, 6], strides = [1, 1]} : vector<320x6xf32> to vector<16x6xf32>
    %43 = vector.extract_strided_slice %38 {offsets = [64, 0], sizes = [16, 6], strides = [1, 1]} : vector<320x6xf32> to vector<16x6xf32>
    %44 = vector.extract_strided_slice %38 {offsets = [80, 0], sizes = [16, 6], strides = [1, 1]} : vector<320x6xf32> to vector<16x6xf32>
    %45 = vector.extract_strided_slice %38 {offsets = [96, 0], sizes = [16, 6], strides = [1, 1]} : vector<320x6xf32> to vector<16x6xf32>
    %46 = vector.extract_strided_slice %38 {offsets = [112, 0], sizes = [16, 6], strides = [1, 1]} : vector<320x6xf32> to vector<16x6xf32>
    %47 = vector.extract_strided_slice %38 {offsets = [128, 0], sizes = [16, 6], strides = [1, 1]} : vector<320x6xf32> to vector<16x6xf32>
    %48 = vector.extract_strided_slice %38 {offsets = [144, 0], sizes = [16, 6], strides = [1, 1]} : vector<320x6xf32> to vector<16x6xf32>
    %49 = vector.extract_strided_slice %38 {offsets = [160, 0], sizes = [16, 6], strides = [1, 1]} : vector<320x6xf32> to vector<16x6xf32>
    %50 = vector.extract_strided_slice %38 {offsets = [176, 0], sizes = [16, 6], strides = [1, 1]} : vector<320x6xf32> to vector<16x6xf32>
    %51 = vector.extract_strided_slice %38 {offsets = [192, 0], sizes = [16, 6], strides = [1, 1]} : vector<320x6xf32> to vector<16x6xf32>
    %52 = vector.extract_strided_slice %38 {offsets = [208, 0], sizes = [16, 6], strides = [1, 1]} : vector<320x6xf32> to vector<16x6xf32>
    %53 = vector.extract_strided_slice %38 {offsets = [224, 0], sizes = [16, 6], strides = [1, 1]} : vector<320x6xf32> to vector<16x6xf32>
    %54 = vector.extract_strided_slice %38 {offsets = [240, 0], sizes = [16, 6], strides = [1, 1]} : vector<320x6xf32> to vector<16x6xf32>
    %55 = vector.extract_strided_slice %38 {offsets = [256, 0], sizes = [16, 6], strides = [1, 1]} : vector<320x6xf32> to vector<16x6xf32>
    %56 = vector.extract_strided_slice %38 {offsets = [272, 0], sizes = [16, 6], strides = [1, 1]} : vector<320x6xf32> to vector<16x6xf32>
    %57 = vector.extract_strided_slice %38 {offsets = [288, 0], sizes = [16, 6], strides = [1, 1]} : vector<320x6xf32> to vector<16x6xf32>
    %58 = vector.extract_strided_slice %38 {offsets = [304, 0], sizes = [16, 6], strides = [1, 1]} : vector<320x6xf32> to vector<16x6xf32>
    %59 = tpu.concatenate %39, %40, %41, %42, %43, %44, %45, %46, %47, %48, %49, %50, %51, %52, %53, %54 in 1 : vector<16x6xf32>, vector<16x6xf32>, vector<16x6xf32>, vector<16x6xf32>, vector<16x6xf32>, vector<16x6xf32>, vector<16x6xf32>, vector<16x6xf32>, vector<16x6xf32>, vector<16x6xf32>, vector<16x6xf32>, vector<16x6xf32>, vector<16x6xf32>, vector<16x6xf32>, vector<16x6xf32>, vector<16x6xf32> -> vector<16x96xf32>
    %60 = tpu.concatenate %55, %56, %57, %58 in 1 : vector<16x6xf32>, vector<16x6xf32>, vector<16x6xf32>, vector<16x6xf32> -> vector<16x24xf32>
    %61 = tpu.concatenate %59, %60 in 1 : vector<16x96xf32>, vector<16x24xf32> -> vector<16x120xf32>
    %cst_13 = arith.constant dense<0.000000e+00> : vector<6x120xf32>
    %62 = tpu.matmul %4, %61, %cst_13 {dimension_numbers = #tpu.dot_dimension_numbers<[1], [0], [0], [1], [0, 0, 1, 1], [], []>} : vector<6x16xf32>, vector<16x120xf32>, vector<6x120xf32> -> vector<6x120xf32>
    %63 = vector.extract_strided_slice %62 {offsets = [0, 0], sizes = [6, 24], strides = [1, 1]} : vector<6x120xf32> to vector<6x24xf32>
    %64 = vector.extract_strided_slice %62 {offsets = [0, 24], sizes = [6, 24], strides = [1, 1]} : vector<6x120xf32> to vector<6x24xf32>
    %65 = vector.extract_strided_slice %62 {offsets = [0, 48], sizes = [6, 24], strides = [1, 1]} : vector<6x120xf32> to vector<6x24xf32>
    %66 = vector.extract_strided_slice %62 {offsets = [0, 72], sizes = [6, 24], strides = [1, 1]} : vector<6x120xf32> to vector<6x24xf32>
    %67 = vector.extract_strided_slice %62 {offsets = [0, 96], sizes = [6, 24], strides = [1, 1]} : vector<6x120xf32> to vector<6x24xf32>
    %68 = arith.mulf %63, %63 : vector<6x24xf32>
    %69 = arith.mulf %64, %64 : vector<6x24xf32>
    %70 = arith.mulf %63, %64 : vector<6x24xf32>
    %71 = arith.subf %65, %68 : vector<6x24xf32>
    %72 = arith.subf %66, %69 : vector<6x24xf32>
    %73 = arith.subf %67, %70 : vector<6x24xf32>
    %cst_14 = arith.constant 2.000000e+00 : f32
    %74 = vector.broadcast %cst_14 : f32 to vector<6x24xf32>
    %75 = arith.mulf %74, %73 : vector<6x24xf32>
    %cst_15 = arith.constant 5.852250e+01 : f32
    %76 = vector.broadcast %cst_15 : f32 to vector<6x24xf32>
    %77 = arith.addf %75, %76 : vector<6x24xf32>
    %78 = arith.addf %71, %72 : vector<6x24xf32>
    %cst_16 = arith.constant 5.852250e+01 : f32
    %79 = vector.broadcast %cst_16 : f32 to vector<6x24xf32>
    %80 = arith.addf %78, %79 : vector<6x24xf32>
    %81 = arith.divf %77, %80 : vector<6x24xf32>
    %cst_17 = arith.constant 2.000000e+00 : f32
    %82 = vector.broadcast %cst_17 : f32 to vector<6x24xf32>
    %83 = arith.mulf %82, %70 : vector<6x24xf32>
    %cst_18 = arith.constant 6.502500e+00 : f32
    %84 = vector.broadcast %cst_18 : f32 to vector<6x24xf32>
    %85 = arith.addf %83, %84 : vector<6x24xf32>
    %86 = arith.addf %68, %69 : vector<6x24xf32>
    %cst_19 = arith.constant 6.502500e+00 : f32
    %87 = vector.broadcast %cst_19 : f32 to vector<6x24xf32>
    %88 = arith.addf %86, %87 : vector<6x24xf32>
    %89 = arith.divf %85, %88 : vector<6x24xf32>
    %90 = arith.mulf %89, %81 : vector<6x24xf32>
    %cst_20 = arith.constant dense<0.000000e+00> : vector<6x4xf32>
    %91 = tpu.matmul %90, %6, %cst_20 {dimension_numbers = #tpu.dot_dimension_numbers<[1], [0], [0], [1], [0, 0, 1, 1], [], []>} : vector<6x24xf32>, vector<24x4xf32>, vector<6x4xf32> -> vector<6x4xf32>
    %cst_21 = arith.constant dense<0.000000e+00> : vector<4xf32>
    %92 = vector.multi_reduction <add>, %91, %cst_21 [0] : vector<6x4xf32> to vector<4xf32>
    %93 = vector.shape_cast %92 : vector<4xf32> to vector<1x4xf32>
    %cst_22 = arith.constant dense<0.000000e+00> : vector<6x4xf32>
    %94 = tpu.matmul %81, %6, %cst_22 {dimension_numbers = #tpu.dot_dimension_numbers<[1], [0], [0], [1], [0, 0, 1, 1], [], []>} : vector<6x24xf32>, vector<24x4xf32>, vector<6x4xf32> -> vector<6x4xf32>
    %cst_23 = arith.constant dense<0.000000e+00> : vector<4xf32>
    %95 = vector.multi_reduction <add>, %94, %cst_23 [0] : vector<6x4xf32> to vector<4xf32>
    %96 = vector.shape_cast %95 : vector<4xf32> to vector<1x4xf32>
    %97 = tpu.concatenate %93, %96 in 1 : vector<1x4xf32>, vector<1x4xf32> -> vector<1x8xf32>
    %c0_24 = arith.constant 0 : index
    %c0_25 = arith.constant 0 : index
    %c0_26 = arith.constant 0 : index
    %98 = vector.load %arg6[%c0_24, %c0_25, %c0_26] : memref<1x1x8xf32, #tpu.memory_space<vmem>>, vector<1x1x8xf32>
    %99 = vector.shape_cast %98 : vector<1x1x8xf32> to vector<1x8xf32>
    %100 = vector.shape_cast %97 : vector<1x8xf32> to vector<1x1x8xf32>
    tpu.vector_store %arg6[%c0_24, %c0_25, %c0_26], %100 {strides = array<i32>} : memref<1x1x8xf32, #tpu.memory_space<vmem>>, vector<1x1x8xf32>,
    return
  }
  func.func @transform_0(%arg0: i32) -> (i32, i32) {
    %c0_i32 = arith.constant 0 : i32
    %c0_i32_0 = arith.constant 0 : i32
    %c0_i32_1 = arith.constant 0 : i32
    return %c0_i32, %c0_i32_0 : i32, i32
  }
  func.func @transform_1(%arg0: i32) -> (i32, i32) {
    %c0_i32 = arith.constant 0 : i32
    %c0_i32_0 = arith.constant 0 : i32
    %c0_i32_1 = arith.constant 0 : i32
    return %c0_i32, %c0_i32_0 : i32, i32
  }
  func.func @transform_2(%arg0: i32) -> (i32, i32) {
    %c0_i32 = arith.constant 0 : i32
    %c0_i32_0 = arith.constant 0 : i32
    %c0_i32_1 = arith.constant 0 : i32
    return %c0_i32, %c0_i32_0 : i32, i32
  }
  func.func @transform_3(%arg0: i32) -> (i32, i32, i32, i32) {
    %c0_i32 = arith.constant 0 : i32
    %c0_i32_0 = arith.constant 0 : i32
    %c0_i32_1 = arith.constant 0 : i32
    %c0_i32_2 = arith.constant 0 : i32
    return %arg0, %c0_i32, %c0_i32_0, %c0_i32_1 : i32, i32, i32, i32
  }
  func.func @transform_4(%arg0: i32) -> (i32, i32, i32, i32) {
    %c0_i32 = arith.constant 0 : i32
    %c0_i32_0 = arith.constant 0 : i32
    %c0_i32_1 = arith.constant 0 : i32
    %c0_i32_2 = arith.constant 0 : i32
    return %arg0, %c0_i32, %c0_i32_0, %c0_i32_1 : i32, i32, i32, i32
  }
  func.func @transform_5(%arg0: i32) -> (i32, i32, i32) {
    %c0_i32 = arith.constant 0 : i32
    %c0_i32_0 = arith.constant 0 : i32
    %c0_i32_1 = arith.constant 0 : i32
    return %arg0, %c0_i32, %c0_i32_0 : i32, i32, i32
  }
}

</mosaic_0001>

<bundles_post_ra>
// kernel: tpu_custom_call.1
= control target key start
LH: loop header
LB: loop body
LE: loop exit
PB: predicated region body
PF: predicated region fallthrough
CT: control target
= control target key end

     0   :  { %s1785_s0 = inlined_call_operand.vmem [shape: f32[6,16], index: 0, kind: input, shape index: {}]   ;;  %s1786_s1 = inlined_call_operand.vmem [shape: f32[16,6], index: 1, kind: input, shape index: {}]   ;;  %s1787_s2 = inlined_call_operand.vmem [shape: f32[24,4], index: 2, kind: input, shape index: {}]   ;;  %s1788_s3 = inlined_call_operand.hbm [shape: f32[2,4,16,16], index: 3, kind: input, shape index: {}]   ;;  %s1789_s4 = inlined_call_operand.hbm [shape: f32[2,4,16,16], index: 4, kind: input, shape index: {}]   ;;  %s1790_s5 = inlined_call_operand.hbm [shape: f32[2,1,8], index: 5, kind: output, shape index: {}]  }
   0x1   :  { %1793 = sst [smem:[#allocation13_spill]] %s1788_s3 }
   0x2   :  { %10 = vsyncpa [#allocation3], 0 }
   0x3   :  { %12 = vsyncpa [#allocation3 + $0x1], 0 }
   0x4   :  { %13 = vsyncpa [#allocation6], 0 }
   0x5   :  { %15 = vsyncpa [#allocation6 + $0x1], 0 }
   0x6   :  { %16 = vsyncpa [#allocation4], 0 }
   0x7   :  { %18 = vsyncpa [#allocation4 + $0x1], 0  ;;  %s1478_s18 = smov 0   ;;  %s1480_s19 = smov 0  }
   0x8   :  { %s1482_s20 = smov 0   ;;  %s1484_s21 = smov 0  }
   0x9 LB: > { %1794 = sst [smem:[#allocation11_spill]] %s1421_s20  ;;  %s1499_s22 = sadd.s32 4294967295, %s1425_s21   ;;  %s1425_s21 = sphi %s1484_s21, %s1809_s21   ;;  %s1421_s20 = sphi %s1482_s20, %s1806_s20   ;;  %s1417_s19 = sphi %s1480_s19, %s1808_s19   ;;  %s1413_s18 = sphi %s1478_s18, %s1807_s18  }
   0xa   : > { %s1059_s23 = sadd.s32 4294967294, %s1425_s21   ;;  %s1503_s24 = sadd.s32 1, %s1425_s21  }
   0xb   : > { %s94_s25 = sadd.s32 1, %s1421_s20  ;;  %s91_s26 = ssub.s32 %s1425_s21, %s1503_s24 }
   0xc   : > { %p101_p0 = scmp.ne.s32.totalorder %s1421_s20, %s1417_s19  ;;  %p92_p1 = scmp.eq.s32.totalorder %s91_s26, 0 }
   0xd   : > { %p102_p2 = scmp.eq.s32.totalorder %s1425_s21, 0  ;;  %p107_p3 = scmp.ne.s32.totalorder %s1417_s19, %s1413_s18 }
   0xe   : > { %p108_p4 = scmp.eq.s32.totalorder %s1499_s22, 0  ;;  %p157_p7 = scmp.eq.s32.totalorder %s1499_s22, 1 }
   0xf   : > { %s1515_s27 = scalar_select %p92_p1, %s1421_s20, %s94_s25  }
  0x10   : > { %p1517_p5 = por %p102_p2, %p101_p0  ;;  %p1521_p6 = por %p108_p4, %p107_p3 }
  0x11   : > { %1795 = sst [smem:[#allocation12_spill]] %s1515_s27  ;;  %p163_p8 = scmp.eq.s32.totalorder %s1059_s23, 1 }
  0x12   : > { %p1141_p10 = scmp.lt.s32.totalorder %s1425_s21, 2  ;;  %p1528_p11 = por %p157_p7, %p101_p0 }
  0x13   : > { %p1532_p12 = por %p163_p8, %p107_p3  ;;  %s1537_s7 = sand.u32 1, %s1421_s20  }
  0x14   : > { %s1116_s8 = sshll.u32 %s1425_s21, 6  ;;  %s1791_s9 = sshll.u32 %s1537_s7, 6 }
  0x15   : > { %s1800_s3 = sld [smem:[#allocation13_spill]]  ;;  %s196_s14 = scalar_lea.vmem [#allocation2], %s1791_s9 }
  0x16   : > { %s204_s15 = sshll.u32 %s196_s14, 4  ;;  %p1550_p13 = pnand %p1141_p10, %p1517_p5  ;;  %s205_s15 = int_to_ptr.vmem [resolvable:$true] %s204_s15 }
  0x17   : > { %p1068_p0 = scmp.ge.s32.totalorder %s1425_s21, 1  ;;  %p234_p1 = scmp.lt.s32.totalorder %s1425_s21, 3 }
  0x18   : > { %s193_s17 = scalar_lea.sflag [#allocation3], %s1537_s7  ;;  %p1299_p3 = pneg %p1550_p13 }
  0x1b   : > { %s201_s12 = scalar_lea.hbm %s1800_s3, %s1116_s8  ;;  %s1302_s10 = scalar_lea.hbm %s1800_s3, 128 }
  0x1c   : > { %s202_s13 = sshll.u32 %s201_s12, 4  ;;  %s203_s13 = int_to_ptr.hbm [resolvable:$true] %s202_s13 }
  0x1d   : > { %s1295_s23 = sshra.s32 %s203_s13, 4  ;;  %s1296_s23 = int_to_ptr.hbm [resolvable:$true] %s1295_s23 }
  0x1e   : > { %s1297_s25 = scalar_lea.hbm %s1296_s23, 64  ;;  %p1303_p5 = scmp.lt.s32.totalorder %s1296_s23, %s1800_s3 }
  0x1f   : > { %p1298_p2 = scmp.ne.s32.totalorder %s1296_s23, %s1297_s25  ;;  %p1304_p8 = scmp.lt.s32.totalorder %s1302_s10, %s1297_s25 }
  0x21   : > { %p1300_p4 = pnand %p1299_p3, %p1298_p2  ;;  %p1305_p10 = por %p1304_p8, %p1303_p5 }
  0x23   : > { %p1301_p7 = pneg %p1300_p4 }
  0x25   : > { %p1306_p9 = pnand %p1305_p10, %p1301_p7 }
  0x27   : > { %1309 = shalt.err (!%p1306_p9)
}
  0x28   : > { %s1427_s14 = smov 128   ;;  %s1428_s9 = smov 8  }
  0x29   : > { %1133 = dma.hbm_to_vmem [thread:$0]  (!%p1550_p13), %s203_s13, 1024, %s205_s15, %s193_s17, %s1427_s14, %s1427_s14, %s1428_s9  }
  0x2a   : > { %p1574_p2 = pnand %p1068_p0, %p234_p1  ;;  %s223_s28 = scalar_lea.hbm %s1789_s4, %s1116_s8 }
  0x2b   : > { %s224_s10 = sshll.u32 %s223_s28, 4  ;;  %s1803_s11 = sshll.u32 %s1537_s7, 6  ;;  %s225_s10 = int_to_ptr.hbm [resolvable:$true] %s224_s10 }
  0x2c   : > { %s218_s12 = scalar_lea.vmem [#allocation5], %s1803_s11  ;;  %s215_s27 = scalar_lea.sflag [#allocation6], %s1537_s7 }
  0x2d   : > { %s226_s3 = sshll.u32 %s218_s12, 4  ;;  %s1325_s20 = sshra.s32 %s225_s10, 4  ;;  %s227_s3 = int_to_ptr.vmem [resolvable:$true] %s226_s3  ;;  %s1326_s20 = int_to_ptr.hbm [resolvable:$true] %s1325_s20 }
  0x2e   : > { %s1327_s13 = scalar_lea.hbm %s1326_s20, 64  ;;  %s1332_s23 = scalar_lea.hbm %s1789_s4, 128 }
  0x2f   : > { %p1328_p9 = scmp.ne.s32.totalorder %s1326_s20, %s1327_s13  ;;  %p1333_p4 = scmp.lt.s32.totalorder %s1326_s20, %s1789_s4 }
  0x30   : > { %p1334_p7 = scmp.lt.s32.totalorder %s1332_s23, %s1327_s13 }
  0x31   : > { %p1330_p0 = pnand %p1328_p9, %p1299_p3 }
  0x32   : > { %p1335_p5 = por %p1334_p7, %p1333_p4 }
  0x33   : > { %p1331_p1 = pneg %p1330_p0 }
  0x35   : > { %p1336_p8 = pnand %p1335_p5, %p1331_p1 }
  0x37   : > { %1339 = shalt.err (!%p1336_p8)
}
  0x38   : > { %1136 = dma.hbm_to_vmem [thread:$0]  (!%p1550_p13), %s225_s10, 1024, %s227_s3, %s215_s27, %s1427_s14, %s1427_s14, %s1428_s9  }
  0x39   : > { %238 = sbr.rel (%p1574_p2) target bundleno = 1338 (0x53a), region = 40  ;;  %s1600_s7 = sand.u32 (!%p1574_p2), 1, %s1417_s19  }
  0x3a   : > { %s1069_s28 = sshll.u32 (!%p1574_p2), %s1600_s7, 6  ;;  %s241_s11 = scalar_lea.sflag (!%p1574_p2), [#allocation3], %s1600_s7 }
  0x3b   : > { %s1604_s12 = scalar_lea.vmem (!%p1574_p2), [#allocation2], %s1069_s28 }
  0x3e   : > { %1400 = dma.done.wait (%p1521_p6), %s241_s11, 1024  }
  0x3f   : > { %1402 = vsyncadd (%p1521_p6), %s241_s11, 4294966272  ;;  %s251_s3 = scalar_lea.sflag [#allocation6], %s1600_s7  ;;  %s1611_s20 = scalar_lea.vmem [#allocation5], %s1069_s28 }
  0x40   : > { %1404 = dma.done.wait (%p1521_p6), %s251_s3, 1024  }
  0x41   : > { %1406 = vsyncadd (%p1521_p6), %s251_s3, 4294966272  ;;  %v304_v0 = vld [vmem:[%s1786_s1 + $0x8] sm:$0xff]  ;;  %v303_v1 = vld [vmem:[%s1786_s1] sm:$0xff]  ;;  %vm332_vm0 = vcmask 130048   ;;  %s1429_s29 = smov 6   ;;  %s1430_s26 = smov 12  }
  0x42   : > { %467 = vmatpush.msra.mxu0 %v304_v0  ;;  %1119 = vmatpush.msra.mxu2 %v304_v0  ;;  %v286_v2 = vld [vmem:[%s1604_s12] sm:$0xff]  ;;  %v291_v3 = vld [vmem:[%s1604_s12 + $0x28] sm:$0xff]  ;;  %v1626_v4 = vld [vmem:[%s1611_s20 + $0x38] sm:$0xff]  ;;  %s1431_s10 = smov 18   ;;  %s1432_s13 = smov 42   ;;  %vm710_vm1 = vcmask 48128  }
  0x43   : > { %1120 = vmatpush.msra.mxu3 %v304_v0  ;;  %v313_v5 = vmul.f32 %v291_v3, %v291_v3  ;;  %v323_v6 = vmul.f32 %v1626_v4, %v1626_v4  ;;  %1118 = vmatpush.msra.mxu1 %v304_v0  ;;  %v297_v7 = vld [vmem:[%s1611_s20 + $0x18] sm:$0xff]  ;;  %v292_v8 = vld [vmem:[%s1604_s12 + $0x30] sm:$0xff]  ;;  %v294_v9 = vld [vmem:[%s1611_s20] sm:$0xff]  ;;  %v308_v30 = vmul.f32 %v286_v2, %v286_v2  ;;  %s1433_s15 = smov 36   ;;  %s1434_s17 = smov 54   ;;  %vm713_vm2 = vcmask 97280  }
  0x44   : > { %468 = vmatpush.msra.mxu0 %v303_v1  ;;  %1122 = vmatpush.msra.mxu2 %v303_v1  ;;  %v287_v10 = vld [vmem:[%s1604_s12 + $0x8] sm:$0xff]  ;;  %v314_v11 = vmul.f32 %v292_v8, %v292_v8  ;;  %v324_v12 = vmul.f32 %v294_v9, %v286_v2  ;;  %v298_v13 = vld [vmem:[%s1611_s20 + $0x20] sm:$0xff]  ;;  %v293_v14 = vld [vmem:[%s1604_s12 + $0x38] sm:$0xff]  ;;  %v316_v22 = vmul.f32 %v294_v9, %v294_v9  ;;  %s1435_s23 = smov 24   ;;  %s1436_s8 = smov 72   ;;  %vm716_vm3 = vcmask 146432  }
  0x45   : > { %1123 = vmatpush.msra.mxu3 %v303_v1  ;;  %1071 = vmatmul.msk.f32.vlgmr.msra.gmra.mxu0 %vm332_vm0, %v286_v2  ;;  %v295_v15 = vld [vmem:[%s1611_s20 + $0x8] sm:$0xff]  ;;  %v288_v16 = vld [vmem:[%s1604_s12 + $0x10] sm:$0xff]  ;;  %v315_v17 = vmul.f32 %v293_v14, %v293_v14  ;;  %v289_v21 = vld [vmem:[%s1604_s12 + $0x18] sm:$0xff]  ;;  %v319_v31 = vmul.f32 %v297_v7, %v297_v7  ;;  %v309_v33 = vmul.f32 %v287_v10, %v287_v10  ;;  %s1437_s25 = smov 60   ;;  %s1438_s28 = smov 48   ;;  %vm719_vm4 = vcmask 195584  }
  0x46   : > { %1092 = vmatmul.msk.f32.vlgmr.msra.gmra.mxu2 %vm332_vm0, %v313_v5  ;;  %1102 = vmatmul.msk.f32.vlgmr.msra.gmra.mxu3 %vm332_vm0, %v323_v6  ;;  %v325_v18 = vmul.f32 %v295_v15, %v287_v10  ;;  %v299_v19 = vld [vmem:[%s1611_s20 + $0x28] sm:$0xff]  ;;  %v296_v20 = vld [vmem:[%s1611_s20 + $0x10] sm:$0xff]  ;;  %v290_v25 = vld [vmem:[%s1604_s12 + $0x20] sm:$0xff]  ;;  %v317_v26 = vmul.f32 %v295_v15, %v295_v15  ;;  %v327_v27 = vmul.f32 %v297_v7, %v289_v21  ;;  %s1439_s11 = smov 90   ;;  %s1440_s12 = smov 78   ;;  %vm722_vm5 = vcmask 244736  }
  0x47   : > { %1121 = vmatpush.msra.mxu1 %v303_v1  ;;  %v326_v23 = vmul.f32 %v296_v20, %v288_v16  ;;  %v300_v24 = vld [vmem:[%s1611_s20 + $0x30] sm:$0xff]  ;;  %v318_v28 = vmul.f32 %v296_v20, %v296_v20  ;;  %v328_v29 = vmul.f32 %v298_v13, %v290_v25  ;;  %v329_v32 = vmul.f32 %v299_v19, %v291_v3  ;;  %s1441_s3 = smov 30   ;;  %s1442_s20 = smov 66  }
  0x48   : > { %1082 = vmatmul.msk.f32.vlgmr.msra.gmra.mxu1 %vm332_vm0, %v297_v7  ;;  %v320_v34 = vmul.f32 %v298_v13, %v298_v13  ;;  %v330_v35 = vmul.f32 %v300_v24, %v292_v8  ;;  %v310_v36 = vmul.f32 %v288_v16, %v288_v16  ;;  %v321_v37 = vmul.f32 %v299_v19, %v299_v19  ;;  %s1443_s27 = smov 84   ;;  %s1444_s9 = smov 96  }
  0x49   : > { %v331_v38 = vmul.f32 %v1626_v4, %v293_v14  ;;  %v311_v39 = vmul.f32 %v289_v21, %v289_v21  ;;  %v322_v40 = vmul.f32 %v300_v24, %v300_v24  ;;  %v312_v41 = vmul.f32 %v290_v25, %v290_v25 }
  0x4a   : > { %vm725_vm6 = vcmask 293888   ;;  %vm728_vm7 = vcmask 343040   ;;  %vm731_vm8 = vcmask 392192   ;;  %vm734_vm9 = vcmask 441344  }
  0x4b   : > { %vm737_vm10 = vcmask 490496   ;;  %vm740_vm11 = vcmask 539648   ;;  %vm743_vm12 = vcmask 588800   ;;  %vm746_vm13 = vcmask 637952  }
  0x4c   : > { %vm749_vm14 = vcmask 687104   ;;  %vm752_vm15 = vcmask 736256  }
  0x4d   : > { %1072 = vmatmul.msk.f32.gmra.mxu0 %vm332_vm0, %v287_v10 }
  0x4e   : > { %1093 = vmatmul.msk.f32.gmra.mxu2 %vm332_vm0, %v314_v11  ;;  %1103 = vmatmul.msk.f32.gmra.mxu3 %vm332_vm0, %v324_v12 }
  0x50   : > { %1083 = vmatmul.msk.f32.gmra.mxu1 %vm332_vm0, %v298_v13 }
  0x55   : > { %1073 = vmatmul.msk.f32.gmra.mxu0 %vm332_vm0, %v288_v16 }
  0x56   : > { %1094 = vmatmul.msk.f32.gmra.mxu2 %vm332_vm0, %v315_v17  ;;  %1104 = vmatmul.msk.f32.gmra.mxu3 %vm332_vm0, %v325_v18 }
  0x58   : > { %1084 = vmatmul.msk.f32.gmra.mxu1 %vm332_vm0, %v299_v19 }
  0x5d   : > { %1074 = vmatmul.msk.f32.gmra.mxu0 %vm332_vm0, %v289_v21 }
  0x5e   : > { %1095 = vmatmul.msk.f32.gmra.mxu2 %vm332_vm0, %v316_v22  ;;  %1105 = vmatmul.msk.f32.gmra.mxu3 %vm332_vm0, %v326_v23 }
  0x60   : > { %1085 = vmatmul.msk.f32.gmra.mxu1 %vm332_vm0, %v300_v24 }
  0x65   : > { %1075 = vmatmul.msk.f32.gmra.mxu0 %vm332_vm0, %v290_v25 }
  0x66   : > { %1096 = vmatmul.msk.f32.gmra.mxu2 %vm332_vm0, %v317_v26  ;;  %1106 = vmatmul.msk.f32.gmra.mxu3 %vm332_vm0, %v327_v27 }
  0x68   : > { %1086 = vmatmul.msk.f32.gmra.mxu1 %vm332_vm0, %v1626_v4 }
  0x6d   : > { %1076 = vmatmul.msk.f32.gmra.mxu0 %vm332_vm0, %v291_v3 }
  0x6e   : > { %1097 = vmatmul.msk.f32.gmra.mxu2 %vm332_vm0, %v318_v28  ;;  %1107 = vmatmul.msk.f32.gmra.mxu3 %vm332_vm0, %v328_v29 }
  0x70   : > { %1087 = vmatmul.msk.f32.gmra.mxu1 %vm332_vm0, %v308_v30 }
  0x75   : > { %1077 = vmatmul.msk.f32.gmra.mxu0 %vm332_vm0, %v292_v8 }
  0x76   : > { %1098 = vmatmul.msk.f32.gmra.mxu2 %vm332_vm0, %v319_v31  ;;  %1108 = vmatmul.msk.f32.gmra.mxu3 %vm332_vm0, %v329_v32 }
  0x78   : > { %1088 = vmatmul.msk.f32.gmra.mxu1 %vm332_vm0, %v309_v33 }
  0x7d   : > { %1078 = vmatmul.msk.f32.gmra.mxu0 %vm332_vm0, %v293_v14 }
  0x7e   : > { %1099 = vmatmul.msk.f32.gmra.mxu2 %vm332_vm0, %v320_v34  ;;  %1109 = vmatmul.msk.f32.gmra.mxu3 %vm332_vm0, %v330_v35 }
  0x80   : > { %1089 = vmatmul.msk.f32.gmra.mxu1 %vm332_vm0, %v310_v36 }
  0x85   : > { %1079 = vmatmul.msk.f32.gmra.mxu0 %vm332_vm0, %v294_v9 }
  0x86   : > { %1100 = vmatmul.msk.f32.gmra.mxu2 %vm332_vm0, %v321_v37  ;;  %1110 = vmatmul.msk.f32.gmra.mxu3 %vm332_vm0, %v331_v38 }
  0x88   : > { %1090 = vmatmul.msk.f32.gmra.mxu1 %vm332_vm0, %v311_v39 }
  0x8d   : > { %1080 = vmatmul.msk.f32.gmra.mxu0 %vm332_vm0, %v295_v15 }
  0x8e   : > { %1101 = vmatmul.msk.f32.gmra.mxu2 %vm332_vm0, %v322_v40 }
  0x90   : > { %1091 = vmatmul.msk.f32.gmra.mxu1 %vm332_vm0, %v312_v41 }
  0x95   : > { %1081 = vmatmul.msk.f32.gmra.mxu0 %vm332_vm0, %v296_v20 }
  0xc2   : > { %v1685_v42 = vpop.f32.mrf.mxu0 }
  0xc5   : > { %v1687_v43 = vpop.f32.mrf.mxu1 }
  0xc9   : > { %v1689_v44 = vpop.f32.mrf.mxu2  ;;  %v1691_v45 = vpop.f32.mrf.mxu3 }
  0xca   : > { %v1693_v46 = vpop.f32.mrf.mxu0 }
  0xcd   : > { %v506_v47 = vpop.f32.mrf.mxu1 }
  0xd1   : > { %v1695_v48 = vpop.f32.mrf.mxu2  ;;  %v1697_v49 = vpop.f32.mrf.mxu3 }
  0xd2   : > { %v476_v50 = vpop.f32.mrf.mxu0 }
  0xd5   : > { %v509_v51 = vpop.f32.mrf.mxu1 }
  0xd6   : > { %v1226_v14 = vpack.i.bf16 %v506_v47, %v509_v51 }
  0xd9   : > { %v1699_v52 = vpop.f32.mrf.mxu2  ;;  %v1701_v53 = vpop.f32.mrf.mxu3 }
  0xda   : > { %v1261_v54 = vpack.i.bf16 %v1695_v48, %v1699_v52  ;;  %v479_v55 = vpop.f32.mrf.mxu0 }
  0xdb   : > { %v1211_v26 = vpack.i.bf16 %v476_v50, %v479_v55 }
  0xdd   : > { %v512_v56 = vpop.f32.mrf.mxu1 }
  0xe1   : > { %v542_v57 = vpop.f32.mrf.mxu2  ;;  %v572_v58 = vpop.f32.mrf.mxu3 }
  0xe2   : > { %v482_v59 = vpop.f32.mrf.mxu0 }
  0xe5   : > { %v515_v60 = vpop.f32.mrf.mxu1 }
  0xe6   : > { %v1231_v13 = vpack.i.bf16 %v512_v56, %v515_v60 }
  0xe9   : > { %v545_v61 = vpop.f32.mrf.mxu2  ;;  %v575_v62 = vpop.f32.mrf.mxu3 }
  0xea   : > { %v1196_v63 = vpack.i.bf16 %v572_v58, %v575_v62  ;;  %v485_v0 = vpop.f32.mrf.mxu0  ;;  %v1266_v27 = vpack.i.bf16 %v542_v57, %v545_v61 }
  0xeb   : > { %v1216_v1 = vpack.i.bf16 %v482_v59, %v485_v0 }
  0xec   : > { %1197 = vrot.lane.b32.xlu0 %v1196_v63, %s1429_s29 }
  0xed   : > { %v518_v2 = vpop.f32.mrf.mxu1  ;;  %1217 = vrot.lane.b32.xlu2 %v1216_v1, %s1430_s26 }
  0xf1   : > { %v548_v3 = vpop.f32.mrf.mxu2  ;;  %v578_v4 = vpop.f32.mrf.mxu3 }
  0xf2   : > { %v488_v5 = vpop.f32.mrf.mxu0 }
  0xf5   : > { %v521_v6 = vpop.f32.mrf.mxu1 }
  0xf6   : > { %v1236_v29 = vpack.i.bf16 %v518_v2, %v521_v6 }
  0xf9   : > { %v581_v7 = vpop.f32.mrf.mxu3  ;;  %v551_v8 = vpop.f32.mrf.mxu2 }
  0xfa   : > { %v1201_v9 = vpack.i.bf16 %v578_v4, %v581_v7  ;;  %v491_v10 = vpop.f32.mrf.mxu0  ;;  %v1271_v31 = vpack.i.bf16 %v548_v3, %v551_v8 }
  0xfb   : > { %v1221_v11 = vpack.i.bf16 %v488_v5, %v491_v10 }
  0xfc   : > { %1202 = vrot.lane.b32.xlu0 %v1201_v9, %s1430_s26  ;;  %s1375_s26 = scalar_lea.hbm %s1790_s5, 2 }
  0xfd   : > { %1222 = vrot.lane.b32.xlu2 %v1221_v11, %s1431_s10  ;;  %v524_v12 = vpop.f32.mrf.mxu1 }
 0x101   : > { %v584_v15 = vpop.f32.mrf.mxu3  ;;  %v554_v17 = vpop.f32.mrf.mxu2 }
 0x102   : > { %v494_v16 = vpop.f32.mrf.mxu0 }
 0x104   : > { %1232 = vrot.lane.b32.xlu0 %v1231_v13, %s1432_s13 }
 0x105   : > { %1227 = vrot.lane.b32.xlu2 %v1226_v14, %s1433_s15  ;;  %v527_v18 = vpop.f32.mrf.mxu1 }
 0x106   : > { %v1241_v20 = vpack.i.bf16 %v524_v12, %v527_v18 }
 0x109   : > { %v587_v19 = vpop.f32.mrf.mxu3  ;;  %v557_v24 = vpop.f32.mrf.mxu2 }
 0x10a   : > { %v1206_v21 = vpack.i.bf16 %v584_v15, %v587_v19  ;;  %v497_v22 = vpop.f32.mrf.mxu0  ;;  %v1276_v35 = vpack.i.bf16 %v554_v17, %v557_v24 }
 0x10b   : > { %v1246_v23 = vpack.i.bf16 %v494_v16, %v497_v22 }
 0x10c   : > { %1207 = vrot.lane.b32.xlu1 %v1206_v21, %s1431_s10 }
 0x10d   : > { %1242 = vrot.lane.b32.xlu2 %v1241_v20, %s1434_s17  ;;  %1247 = vrot.lane.b32.xlu0 %v1246_v23, %s1435_s23  ;;  %v530_v25 = vpop.f32.mrf.mxu1 }
 0x10e   : > { %v1251_v28 = vpack.i.bf16 %v530_v25, %v1689_v44 }
 0x111   : > { %v560_v30 = vpop.f32.mrf.mxu2 }
 0x112   : > { %v1281_v32 = vpack.i.bf16 %v560_v30, %v1691_v45  ;;  %v500_v33 = vpop.f32.mrf.mxu0 }
 0x113   : > { %v1256_v34 = vpack.i.bf16 %v500_v33, %v1687_v43 }
 0x114   : > { %1212 = vrot.lane.b32.xlu1 %v1211_v26, %s1429_s29  ;;  %s1445_s29 = smov 104  }
 0x115   : > { %1267 = vrot.lane.b32.xlu2 %v1266_v27, %s1436_s8  ;;  %1252 = vrot.lane.b32.xlu0 %v1251_v28, %s1437_s25  ;;  %s1446_s8 = smov 32   ;;  %s1447_s25 = smov 4  }
 0x11c   : > { %1237 = vrot.lane.b32.xlu1 %v1236_v29, %s1438_s28 }
 0x11d   : > { %1282 = vrot.lane.b32.xlu2 %v1281_v32, %s1439_s11  ;;  %1272 = vrot.lane.b32.xlu0 %v1271_v31, %s1440_s12  ;;  %s966_s12 = scalar_lea.hbm %s1790_s5, %s1499_s22 }
 0x124   : > { %1257 = vrot.lane.b32.xlu1 %v1256_v34, %s1441_s3  ;;  %s285_s3 = scalar_lea.vmem [#allocation7], %s1600_s7 }
 0x12c   : > { %1262 = vrot.lane.b32.xlu1 %v1261_v54, %s1442_s20  ;;  %s968_s20 = sshll.u32 %s285_s3, 4  ;;  %s969_s20 = int_to_ptr.vmem [resolvable:$true] %s968_s20 }
 0x134   : > { %1277 = vrot.lane.b32.xlu1 %v1276_v35, %s1443_s27  ;;  %s970_s27 = sshll.u32 %s966_s12, 4  ;;  %s971_s27 = int_to_ptr.hbm [resolvable:$true] %s970_s27 }
 0x135   : > { %s1369_s16 = sshra.s32 %s971_s27, 4  ;;  %s1370_s16 = int_to_ptr.hbm [resolvable:$true] %s1369_s16 }
 0x136   : > { %s1371_s14 = scalar_lea.hbm %s1370_s16, 1  ;;  %p1376_p10 = scmp.lt.s32.totalorder %s1370_s16, %s1790_s5 }
 0x137   : > { %p1372_p6 = scmp.ne.s32.totalorder %s1370_s16, %s1371_s14  ;;  %p1377_p2 = scmp.lt.s32.totalorder %s1375_s26, %s1371_s14 }
 0x139   : > { %p1373_p13 = pnand %p1372_p6, %p1528_p11  ;;  %p1378_p9 = por %p1377_p2, %p1376_p10 }
 0x13b   : > { %p1374_p3 = pneg %p1373_p13 }
 0x13d   : > { %p1379_p0 = pnand %p1378_p9, %p1374_p3 }
 0x147   : > { %v1218_v40 = vpop.permute.xlu2 %1217 }
 0x148   : > { %v1220_v57 = vunpack.i.h.bf16 %v1218_v40  ;;  %v1219_v58 = vunpack.i.l.bf16 %v1218_v40 }
 0x15e   : > { %v1198_v36 = vpop.permute.xlu0 %1197 }
 0x15f   : > { %v1200_v38 = vunpack.i.h.bf16 %v1198_v36  ;;  %v1199_v39 = vunpack.i.l.bf16 %v1198_v36 }
 0x161   : > { %v779_v45 = vsel %vm710_vm1, %v1697_v49, %v1200_v38  ;;  %v780_v47 = vsel %vm710_vm1, %v1701_v53, %v1199_v39  ;;  %v1223_v49 = vpop.permute.xlu2 %1222 }
 0x162   : > { %v1225_v60 = vunpack.i.h.bf16 %v1223_v49  ;;  %v1224_v53 = vunpack.i.l.bf16 %v1223_v49 }
 0x169   : > { %v1228_v7 = vpop.permute.xlu2 %1227 }
 0x16a   : > { %v1229_v14 = vunpack.i.l.bf16 %v1228_v7  ;;  %v1230_v19 = vunpack.i.h.bf16 %v1228_v7 }
 0x16e   : > { %v1203_v37 = vpop.permute.xlu0 %1202 }
 0x16f   : > { %v1205_v41 = vunpack.i.h.bf16 %v1203_v37  ;;  %v1204_v44 = vunpack.i.l.bf16 %v1203_v37 }
 0x171   : > { %v781_v51 = vsel %vm713_vm2, %v779_v45, %v1205_v41  ;;  %v782_v52 = vsel %vm713_vm2, %v780_v47, %v1204_v44  ;;  %v1243_v15 = vpop.permute.xlu2 %1242 }
 0x172   : > { %v1244_v28 = vunpack.i.l.bf16 %v1243_v15  ;;  %v1245_v31 = vunpack.i.h.bf16 %v1243_v15  ;;  %v306_v15 = vld [vmem:[%s1787_s2 + $0x8] sm:$0xff] }
 0x176   : > { %v1233_v5 = vpop.permute.xlu0 %1232 }
 0x177   : > { %v1234_v17 = vunpack.i.l.bf16 %v1233_v5  ;;  %v1235_v21 = vunpack.i.h.bf16 %v1233_v5  ;;  %v302_v5 = vld [vmem:[%s1785_s0] sm:$0x3f] }
 0x179   : > { %v1268_v32 = vpop.permute.xlu2 %1267 }
 0x17a   : > { %v1269_v40 = vunpack.i.l.bf16 %v1268_v32  ;;  %v1270_v47 = vunpack.i.h.bf16 %v1268_v32 }
 0x17e   : > { %v1208_v43 = vpop.permute.xlu1 %1207 }
 0x17f   : > { %v1210_v48 = vunpack.i.h.bf16 %v1208_v43  ;;  %v1209_v50 = vunpack.i.l.bf16 %v1208_v43  ;;  %v1248_v8 = vpop.permute.xlu0 %1247 }
 0x180   : > { %v1249_v10 = vunpack.i.l.bf16 %v1248_v8 }
 0x181   : > { %v783_v54 = vsel %vm716_vm3, %v781_v51, %v1210_v48  ;;  %v784_v55 = vsel %vm716_vm3, %v782_v52, %v1209_v50 }
 0x182   : > { %v1286_v56 = vpack.i.bf16 %v783_v54, %v784_v55 }
 0x184   : > { %1287 = vrot.lane.b32.xlu0 %v1286_v56, %s1444_s9  ;;  %v1283_v56 = vpop.permute.xlu2 %1282 }
 0x186   : > { %v1213_v59 = vpop.permute.xlu1 %1212 }
 0x187   : > { %v1215_v61 = vunpack.i.h.bf16 %v1213_v59  ;;  %v1214_v62 = vunpack.i.l.bf16 %v1213_v59  ;;  %v1253_v24 = vpop.permute.xlu0 %1252 }
 0x188   : > { %v1254_v34 = vunpack.i.l.bf16 %v1253_v24  ;;  %v1255_v37 = vunpack.i.h.bf16 %v1253_v24 }
 0x189   : > { %v711_v63 = vsel %vm710_vm1, %v1685_v42, %v1215_v61  ;;  %v712_v0 = vsel %vm710_vm1, %v1693_v46, %v1214_v62  ;;  %v1250_v42 = vunpack.i.h.bf16 %v1248_v8  ;;  %vm793_vm1 = vcmask 785408  }
 0x18a   : > { %v714_v1 = vsel %vm713_vm2, %v711_v63, %v1220_v57  ;;  %v715_v2 = vsel %vm713_vm2, %v712_v0, %v1219_v58 }
 0x18b   : > { %v717_v3 = vsel %vm716_vm3, %v714_v1, %v1225_v60  ;;  %v718_v4 = vsel %vm716_vm3, %v715_v2, %v1224_v53  ;;  %v1284_v60 = vunpack.i.l.bf16 %v1283_v56  ;;  %v1285_v1 = vunpack.i.h.bf16 %v1283_v56 }
 0x18c   : > { %v721_v46 = vsel %vm719_vm4, %v718_v4, %v1249_v10  ;;  %v720_v16 = vsel %vm719_vm4, %v717_v3, %v1250_v42 }
 0x18e   : > { %v1238_v6 = vpop.permute.xlu1 %1237 }
 0x18f   : > { %v1239_v22 = vunpack.i.l.bf16 %v1238_v6  ;;  %v1240_v27 = vunpack.i.h.bf16 %v1238_v6  ;;  %v1273_v44 = vpop.permute.xlu0 %1272 }
 0x190   : > { %v1274_v51 = vunpack.i.l.bf16 %v1273_v44  ;;  %v1275_v55 = vunpack.i.h.bf16 %v1273_v44 }
 0x196   : > { %v1258_v9 = vpop.permute.xlu1 %1257 }
 0x197   : > { %v1259_v11 = vunpack.i.l.bf16 %v1258_v9  ;;  %v1260_v12 = vunpack.i.h.bf16 %v1258_v9 }
 0x199   : > { %v724_v13 = vsel %vm722_vm5, %v721_v46, %v1259_v11  ;;  %v723_v18 = vsel %vm722_vm5, %v720_v16, %v1260_v12  ;;  %v305_v16 = vld [vmem:[%s1787_s2] sm:$0xff] }
 0x19a   : > { %v727_v20 = vsel %vm725_vm6, %v724_v13, %v1229_v14  ;;  %v726_v23 = vsel %vm725_vm6, %v723_v18, %v1230_v19  ;;  %v307_v14 = vld [vmem:[%s1787_s2 + $0x10] sm:$0xff] }
 0x19b   : > { %v730_v25 = vsel %vm728_vm7, %v727_v20, %v1234_v17  ;;  %v729_v29 = vsel %vm728_vm7, %v726_v23, %v1235_v21  ;;  %935 = vmatpush.msrb.mxu3 %v307_v14  ;;  %905 = vmatpush.msrb.mxu2 %v307_v14 }
 0x19c   : > { %v733_v30 = vsel %vm731_vm8, %v730_v25, %v1239_v22  ;;  %v732_v33 = vsel %vm731_vm8, %v729_v29, %v1240_v27 }
 0x19d   : > { %v736_v35 = vsel %vm734_vm9, %v733_v30, %v1244_v28  ;;  %v735_v38 = vsel %vm734_vm9, %v732_v33, %v1245_v31  ;;  %936 = vmatpush.msrb.mxu3 %v306_v15  ;;  %906 = vmatpush.msrb.mxu2 %v306_v15 }
 0x19e   : > { %v1263_v26 = vpop.permute.xlu1 %1262  ;;  %v739_v41 = vsel %vm737_vm10, %v736_v35, %v1254_v34  ;;  %v738_v48 = vsel %vm737_vm10, %v735_v38, %v1255_v37  ;;  %vm912_vm10 = vcmask 29696  }
 0x19f   : > { %v1264_v36 = vunpack.i.l.bf16 %v1263_v26  ;;  %v1265_v39 = vunpack.i.h.bf16 %v1263_v26  ;;  %937 = vmatpush.msrb.mxu3 %v305_v16  ;;  %907 = vmatpush.msrb.mxu2 %v305_v16 }
 0x1a1   : > { %v742_v43 = vsel %vm740_vm11, %v739_v41, %v1264_v36  ;;  %v741_v50 = vsel %vm740_vm11, %v738_v48, %v1265_v39  ;;  %vm955_vm11 = vcmask 57344  }
 0x1a2   : > { %v745_v52 = vsel %vm743_vm12, %v742_v43, %v1269_v40  ;;  %v744_v57 = vsel %vm743_vm12, %v741_v50, %v1270_v47 }
 0x1a3   : > { %v748_v49 = vsel %vm746_vm13, %v745_v52, %v1274_v51  ;;  %v747_v53 = vsel %vm746_vm13, %v744_v57, %v1275_v55 }
 0x1a6   : > { %v1278_v45 = vpop.permute.xlu1 %1277 }
 0x1a7   : > { %v1279_v54 = vunpack.i.l.bf16 %v1278_v45  ;;  %v1280_v58 = vunpack.i.h.bf16 %v1278_v45 }
 0x1a9   : > { %v751_v59 = vsel %vm749_vm14, %v748_v49, %v1279_v54  ;;  %v750_v0 = vsel %vm749_vm14, %v747_v53, %v1280_v58 }
 0x1aa   : > { %v754_v2 = vsel %vm752_vm15, %v751_v59, %v1284_v60  ;;  %v753_v4 = vsel %vm752_vm15, %v750_v0, %v1285_v1 }
 0x1f6   : > { %v1288_v61 = vpop.permute.xlu0 %1287 }
 0x1f7   : > { %v1290_v62 = vunpack.i.h.bf16 %v1288_v61  ;;  %v1289_v63 = vunpack.i.l.bf16 %v1288_v61 }
 0x1f9   : > { %v795_v3 = vsel %vm793_vm1, %v754_v2, %v1289_v63  ;;  %v794_v6 = vsel %vm793_vm1, %v753_v4, %v1290_v62 }
 0x1fa   : > { %813 = vmatpush.msrb.mxu1 %v795_v3 }
 0x1fc   : > { %814 = vmatpush.msrb.mxu1 %v794_v6 }
 0x1fd   : > { %1111 = vmatmul.msk.f32.vlgmr.msrb.gmra.mxu1 %vm332_vm0, %v302_v5 }
 0x27a   : > { %v816_v7 = vpop.f32.mrf.mxu1 }
 0x27b   : > { %821 = vrot.lane.b32.xlu0 %v816_v7, %s1445_s29  ;;  %v819_v8 = vmul.f32 %v816_v7, %v816_v7 }
 0x27d   : > { %826 = vrot.lane.b32.xlu1 %v819_v8, %s1438_s28 }
 0x2ed   : > { %v822_v11 = vpop.permute.xlu0 %821 }
 0x2ee   : > { %v824_v42 = vmul.f32 %v822_v11, %v816_v7 }
 0x2ef   : > { %v827_v9 = vpop.permute.xlu1 %826 }
 0x2f0   : > { %v829_v10 = vsub.f32 %v816_v7, %v827_v9  ;;  %v862_v43 = vmul.f32 2.0, %v824_v42 }
 0x2f2   : > { %838 = vrot.lane.b32.xlu2 %v829_v10, %s1445_s29  ;;  %v863_v50 = vadd.f32 6.5025, %v862_v43 }
 0x2fa   : > { %831 = vrot.lane.b32.xlu2 %v824_v42, %s1444_s9  ;;  %s958_s9 = scalar_lea.sflag [#allocation4], %s1600_s7 }
 0x34c   : > { %v839_v12 = vpop.permute.xlu2 %838 }
 0x34d   : > { %v841_v46 = vadd.f32 %v839_v12, %v829_v10 }
 0x34f   : > { %v842_v13 = vadd.f32 58.5225, %v841_v46 }
 0x351   : > { %844 = vrot.lane.b32.xlu1 %v842_v13, %s1438_s28 }
 0x354   : > { %v832_v18 = vpop.permute.xlu2 %831 }
 0x355   : > { %v834_v20 = vsub.f32 %v816_v7, %v832_v18 }
 0x357   : > { %v835_v24 = vmul.f32 2.0, %v834_v20 }
 0x359   : > { %864 = vrot.lane.b32.xlu1 %v819_v8, %s1445_s29  ;;  %v836_v29 = vadd.f32 58.5225, %v835_v24 }
 0x3c3   : > { %v845_v17 = vpop.permute.xlu1 %844 }
 0x3c4   : > { %1291 = vrcp.f32 %v845_v17  ;;  %v858_v23 = vand.u32 2147483648, %v845_v17  ;;  %v856_v26 = vand.u32 2147483647, %v845_v17  ;;  %vm852_vm2 = vweird.f32 %v845_v17 }
 0x3c6   : > { %v859_v28 = vor.u32 1.1754944e-38, %v858_v23  ;;  %vm857_vm5 = vcmp.eq.f32.partialorder %v856_v26, 8.507059e+37 }
 0x3ca   : > { %v1292_v19 = vpop.eup %1291 }
 0x3cb   : > { %v848_v21 = vmul.f32 %v1292_v19, %v845_v17  ;;  %vm853_vm0 = vweird.f32 %v1292_v19  ;;  %v865_v33 = vpop.permute.xlu1 %864 }
 0x3cc   : > { %vm854_vm3 = vmor %vm852_vm2, %vm853_vm0  ;;  %v867_v34 = vadd.f32 %v865_v33, %v819_v8 }
 0x3cd   : > { %v849_v22 = vsub.f32 1.0, %v848_v21 }
 0x3ce   : > { %v868_v35 = vadd.f32 6.5025, %v867_v34 }
 0x3cf   : > { %v850_v25 = vmul.f32 %v1292_v19, %v849_v22 }
 0x3d0   : > { %1293 = vrcp.f32 %v868_v35  ;;  %v880_v41 = vand.u32 2147483648, %v868_v35  ;;  %vm874_vm7 = vweird.f32 %v868_v35  ;;  %v878_v44 = vand.u32 2147483647, %v868_v35 }
 0x3d1   : > { %v851_v27 = vadd.f32 %v1292_v19, %v850_v25 }
 0x3d2   : > { %v881_v47 = vor.u32 1.1754944e-38, %v880_v41  ;;  %vm879_vm9 = vcmp.eq.f32.partialorder %v878_v44, 8.507059e+37 }
 0x3d3   : > { %v855_v30 = vsel %vm854_vm3, %v1292_v19, %v851_v27 }
 0x3d4   : > { %v860_v31 = vsel %vm857_vm5, %v859_v28, %v855_v30 }
 0x3d5   : > { %v861_v32 = vmul.f32 %v860_v31, %v836_v29 }
 0x3d6   : > { %v1294_v36 = vpop.eup %1293 }
 0x3d7   : > { %885 = vrot.lane.b32.xlu0 %v861_v32, %s1446_s8  ;;  %v870_v37 = vmul.f32 %v1294_v36, %v868_v35  ;;  %vm875_vm6 = vweird.f32 %v1294_v36 }
 0x3d8   : > { %vm876_vm8 = vmor %vm874_vm7, %vm875_vm6 }
 0x3d9   : > { %v871_v38 = vsub.f32 1.0, %v870_v37 }
 0x3db   : > { %v872_v39 = vmul.f32 %v1294_v36, %v871_v38 }
 0x3dd   : > { %v873_v40 = vadd.f32 %v1294_v36, %v872_v39 }
 0x3df   : > { %v877_v45 = vsel %vm876_vm8, %v1294_v36, %v873_v40 }
 0x3e0   : > { %v882_v48 = vsel %vm879_vm9, %v881_v47, %v877_v45 }
 0x3e1   : > { %v883_v51 = vmul.f32 %v882_v48, %v863_v50 }
 0x449   : > { %v886_v52 = vpop.permute.xlu0 %885 }
 0x44a   : > { %v888_v54 = vmul.f32 %v886_v52, %v883_v51  ;;  %1113 = vmatmul.msk.f32.vlgmr.msrb.gmra.mxu3 %vm719_vm4, %v886_v52 }
 0x44c   : > { %1112 = vmatmul.msk.f32.vlgmr.msrb.gmra.mxu2 %vm719_vm4, %v888_v54  ;;  %vm953_vm4 = vcmask 31744  }
 0x4cd   : > { %v939_v55 = vpop.f32.mrf.mxu3 }
 0x4ce   : > { %v942_v56 = vsel %vm912_vm10, %v939_v55, 0.0 }
 0x4cf   : > { %v943_v57 = vrot.slane %v942_v56, 4  ;;  %v909_v61 = vpop.f32.mrf.mxu2 }
 0x4d0   : > { %v913_v62 = vsel %vm912_vm10, %v909_v61, 0.0 }
 0x4d1   : > { %v944_v58 = vadd.f32 %v943_v57, %v942_v56  ;;  %v914_v63 = vrot.slane %v913_v62, 4 }
 0x4d3   : > { %v945_v49 = vrot.slane %v944_v58, 2  ;;  %v915_v0 = vadd.f32 %v914_v63, %v913_v62 }
 0x4d5   : > { %v946_v59 = vadd.f32 %v945_v49, %v944_v58  ;;  %v916_v1 = vrot.slane %v915_v0, 2 }
 0x4d7   : > { %v947_v60 = vrot.slane %v946_v59, 1  ;;  %v917_v2 = vadd.f32 %v916_v1, %v915_v0 }
 0x4d9   : > { %v948_v53 = vadd.f32 %v947_v60, %v946_v59  ;;  %v918_v3 = vrot.slane %v917_v2, 1 }
 0x4db   : > { %950 = vrot.lane.b32.xlu2 %v948_v53, %s1447_s25  ;;  %v919_v4 = vadd.f32 %v918_v3, %v917_v2 }
 0x535   : > { %v951_v5 = vpop.permute.xlu2 %950 }
 0x536   : > { %v954_v6 = vsel %vm953_vm4, %v919_v4, %v951_v5 }
 0x537   : > { %956 = vst.msk [vmem:[%s285_s3] sm:$0x1] %vm955_vm11, %v954_v6 }
 0x538   : > { %1382 = shalt.err (!%p1379_p0)
}
 0x539   : > { %1128 = dma.vmem_to_hbm [thread:$0]  (%p1528_p11), %s969_s20, 16, %s971_s27, %s958_s9  }
 0x53a PF: > { %s982_s7 = sand.u32 1, %s1413_s18   ;;  %p1804_p1 = scmp.ge.s32.totalorder %s1425_s21, 2 }
 0x53b   : > { %s983_s15 = scalar_lea.sflag [#allocation4], %s982_s7 }
 0x53c   : > { %p1138_p4 = pnand %p1804_p1, %p1532_p12 }
 0x53e   : > { %p1139_p7 = pneg %p1138_p4 }
 0x540   : > { %1408 = dma.done.wait (%p1139_p7), %s983_s15, 16  }
 0x541   : > { %1410 = vsyncadd (%p1139_p7), %s983_s15, 4294967280  ;;  %s1805_s17 = sld [smem:[#allocation11_spill]]  ;;  %p21_p5 = scmp.ge.s32.totalorder %s1503_s24, 4  }
 0x542   : > { %s1806_s20 = sld [smem:[#allocation12_spill]]  ;;  %s1807_s18 = smov %s1417_s19 }
 0x543   : > { %s1809_s21 = smov %s1503_s24  ;;  %23 = sbr.rel (!%p21_p5) target bundleno = 9 (0x9), region = 98 }
 0x547   : > { %s1808_s19 = smov %s1805_s17 }
 0x548   :  { %988 = vsyncpa [#allocation3], 1 }
 0x549   :  { %990 = vsyncpa [#allocation3 + $0x1], 1 }
 0x54a   :  { %991 = vsyncpa [#allocation6], 1 }
 0x54b   :  { %993 = vsyncpa [#allocation6 + $0x1], 1 }
 0x54c   :  { %994 = vsyncpa [#allocation4], 1 }
 0x54d   :  { %996 = vsyncpa [#allocation4 + $0x1], 1 }

</bundles_post_ra>
